<compile_context>
chip_gen: v5e
topology: v5e:2x2
jax: 0.10.0
libtpu: 0.0.40
codegen_flags: <defaults>
</compile_context>

<pallas_src>
import functools

import jax
import jax.numpy as jnp
from jax.experimental import pallas as pl
from jax.experimental.pallas import tpu as pltpu


def _round_up(x: int, m: int) -> int:
    return ((x + m - 1) // m) * m


def _mlp_kernel(*refs, num_layers, sigmoid_output):
    # refs = (x_ref, w0, b0, w1, b1, ..., w_{L-1}, b_{L-1}, o_ref)
    x_ref = refs[0]
    o_ref = refs[1 + 2 * num_layers]

    h = x_ref[...].astype(jnp.float32)                    # (tile_m, K0_pad)
    for i in range(num_layers):                           # static, unrolled layer loop
        w = refs[1 + 2 * i][...]                          # (K_pad, N_pad) bf16, pre-transposed
        b = refs[2 + 2 * i][...]                          # (1, N_pad)   f32
        # bf16 feed to the MXU at native rate, f32 accumulation; bias add / ReLU on VPU in f32.
        h = jnp.dot(h.astype(jnp.bfloat16), w,
                    preferred_element_type=jnp.float32) + b
        if i < num_layers - 1:
            h = jnp.maximum(h, 0.0)                       # ReLU (VPU)
    if sigmoid_output:
        h = jax.nn.sigmoid(h)                             # EUP exp/recip
    o_ref[...] = h.astype(o_ref.dtype)


class MLP:
    """JAX/Pallas port of the PyTorch MLP module (forward pass only)."""

    # Cap on the row-tile. On v5e (single vst slot) a tile_m sweep over {128,256,512} may
    # prefer a smaller value; 512 is a good default for v6e/v7x.
    MAX_TILE_M = 512

    def __init__(self, input_dim, hidden_dim, output_dim, num_layers,
                 sigmoid_output=False, dropout=0.0, key=None, feature_align=128):
        # feature_align=128 is optimal on v5e (4x128 MXU) and minimizes padding waste.
        # On v6e/v7x with *large* hidden dims, feature_align=256 better fills the 2x256 MXU
        # (re-check the VMEM budget on v7x if you enable that).
        self.num_layers = num_layers
        self.sigmoid_output = sigmoid_output
        self.input_dim = input_dim
        self.output_dim = output_dim
        # dropout == 0.0 -> nn.Identity in the reference module (eval semantics).
        # TODO(synk): dropout > 0 (training-mode Bernoulli masking) not implemented.
        assert dropout == 0.0, "only dropout=0 (Identity) is supported"

        h = [hidden_dim] * (num_layers - 1)
        dims = list(zip([input_dim] + h, h + [output_dim]))
        if key is None:
            key = jax.random.PRNGKey(0)

        self.params = []          # original f32 (out, in)/(out,) weights (reference use)
        self.padded_params = []   # lane-dense, pre-transposed bf16 weights + f32 biases
        for (n_in, n_out) in dims:
            key, kw, kb = jax.random.split(key, 3)
            bound = 1.0 / float(n_in) ** 0.5              # PyTorch nn.Linear default init
            w = jax.random.uniform(kw, (n_out, n_in), jnp.float32, -bound, bound)
            b = jax.random.uniform(kb, (n_out,), jnp.float32, -bound, bound)
            self.params.append((w, b))

            k_pad = _round_up(n_in, feature_align)
            n_pad = _round_up(n_out, feature_align)
            # bf16 weights (half the HBM/VMEM footprint); zero padding keeps pad lanes exact 0.
            w_t = jnp.zeros((k_pad, n_pad), jnp.bfloat16).at[:n_in, :n_out].set(
                w.T.astype(jnp.bfloat16))
            b_p = jnp.zeros((1, n_pad), jnp.float32).at[0, :n_out].set(b)
            self.padded_params.append((w_t, b_p))

        self.k0_pad = _round_up(input_dim, feature_align)
        self.out_pad = _round_up(output_dim, feature_align)

    # ------------------------------------------------------------------ helpers

    def _vmem_limit_bytes(self, tile_m, in_dtype, out_dtype, weight_buffers):
        """Size the scoped-VMEM limit from the real footprint (+ slack), capped for v7x."""
        in_b = jnp.dtype(in_dtype).itemsize
        out_b = jnp.dtype(out_dtype).itemsize
        total = 2 * tile_m * self.k0_pad * in_b            # double-buffered input tile
        total += 2 * tile_m * self.out_pad * out_b         # double-buffered output tile
        max_n = self.k0_pad
        for (w_t, b_p) in self.padded_params:
            total += weight_buffers * (int(w_t.size) * w_t.dtype.itemsize
                                       + int(b_p.size) * b_p.dtype.itemsize)
            max_n = max(max_n, w_t.shape[1])
        total += 2 * tile_m * max_n * 4                    # f32 intermediate h (headroom)
        limit = int(1.5 * total) + (4 << 20)               # slack for compiler scratch
        return int(min(max(limit, 32 << 20), 64 << 20))    # 64 MiB = v7x physical VMEM

    def _forward_pallas(self, x_pad, m_rows, tile_m, grid_m, single_buffer_weights):
        kernel = functools.partial(_mlp_kernel, num_layers=self.num_layers,
                                   sigmoid_output=self.sigmoid_output)

        weight_kwargs = {}
        if single_buffer_weights:
            # Constant index_map -> block is fetched once; double-buffering it wastes VMEM.
            weight_kwargs = dict(pipeline_mode=pl.Buffered(1))

        in_specs = [pl.BlockSpec((tile_m, self.k0_pad), lambda i: (i, 0))]
        operands = [x_pad]
        for (w_t, b_p) in self.padded_params:
            in_specs.append(pl.BlockSpec(w_t.shape, lambda i: (0, 0), **weight_kwargs))
            in_specs.append(pl.BlockSpec(b_p.shape, lambda i: (0, 0), **weight_kwargs))
            operands.append(w_t)
            operands.append(b_p)

        out_dtype = x_pad.dtype
        vmem_limit = self._vmem_limit_bytes(
            tile_m, x_pad.dtype, out_dtype,
            weight_buffers=1 if single_buffer_weights else 2)

        return pl.pallas_call(
            kernel,
            out_shape=jax.ShapeDtypeStruct((m_rows, self.out_pad), out_dtype),
            grid=(grid_m,),
            in_specs=in_specs,
            out_specs=pl.BlockSpec((tile_m, self.out_pad), lambda i: (i, 0)),
            compiler_params=pltpu.CompilerParams(
                dimension_semantics=("parallel",),
                vmem_limit_bytes=vmem_limit),
        )(*operands)

    # ------------------------------------------------------------------ forward

    def __call__(self, x):
        assert x.shape[-1] == self.input_dim
        lead_shape = x.shape[:-1]
        x2d = x.reshape(-1, self.input_dim)
        M = x2d.shape[0]

        # Feature-axis pad only, and only when the feature dim is not already lane-dense.
        if self.k0_pad != self.input_dim:
            x2d = jnp.pad(x2d, ((0, 0), (0, self.k0_pad - self.input_dim)))

        # Sublane granule for the input dtype (8 for f32, 16 for bf16, 32 for int8/fp8).
        granule = {4: 8, 2: 16, 1: 32}.get(jnp.dtype(x2d.dtype).itemsize, 8)
        if M <= granule:
            tile_m = granule
        else:
            # >= 2 blocks whenever possible (megacore / v7x dual-TC), capped for VMEM.
            tile_m = min(self.MAX_TILE_M, _round_up(pl.cdiv(M, 2), granule))
        grid_m = pl.cdiv(M, tile_m)   # ragged trailing block is masked by Pallas — no M pad

        out = None
        err = None
        for single_buffer_weights in (True, False):
            try:
                out = self._forward_pallas(x2d, M, tile_m, grid_m, single_buffer_weights)
                break
            except Exception as e:   # fallback if pl.Buffered(1) is unsupported here
                err = e
        if out is None:
            raise err

        if self.out_pad != self.output_dim:
            out = out[:, :self.output_dim]
        return out.reshape(*lead_shape, self.output_dim)


def _reference_forward(mlp, x):
    """Plain-JAX reference matching the kernel's bf16-feed / f32-accumulate numerics."""
    y = x.reshape(-1, x.shape[-1]).astype(jnp.float32)
    n = len(mlp.params)
    for i, (w, b) in enumerate(mlp.params):
        y = jnp.dot(y.astype(jnp.bfloat16), w.T.astype(jnp.bfloat16),
                    preferred_element_type=jnp.float32) + b
        if i < n - 1:
            y = jnp.maximum(y, 0.0)
    if mlp.sigmoid_output:
        y = jax.nn.sigmoid(y)
    return y.reshape(*x.shape[:-1], mlp.output_dim)


if __name__ == "__main__":
    key = jax.random.PRNGKey(0)
    kx, kp = jax.random.split(key)

    # Small shapes implied by the forward: token features (batch, seq, input_dim).
    batch, seq = 2, 8
    input_dim, hidden_dim, output_dim, num_layers = 32, 64, 16, 3

    x = jax.random.normal(kx, (batch, seq, input_dim), jnp.float32)

    mlp = MLP(input_dim, hidden_dim, output_dim, num_layers,
              sigmoid_output=True, dropout=0.0, key=kp)

    out = jax.block_until_ready(mlp(x))

    ref = _reference_forward(mlp, x)
    assert out.shape == (batch, seq, output_dim)
    assert jnp.allclose(out, ref, atol=1e-3, rtol=1e-3), "mismatch vs. JAX reference"

    print("KERNEL_OK")
</pallas_src>

<mosaic_0001>
module attributes {stable_mosaic.version = 11 : i64} {
  func.func @_mlp_kernel(%arg0: i32, %arg1: memref<8x128xf32, #tpu.memory_space<vmem>>, %arg2: memref<128x128xbf16, #tpu.memory_space<vmem>>, %arg3: memref<1x128xf32, #tpu.memory_space<vmem>>, %arg4: memref<128x128xbf16, #tpu.memory_space<vmem>>, %arg5: memref<1x128xf32, #tpu.memory_space<vmem>>, %arg6: memref<128x128xbf16, #tpu.memory_space<vmem>>, %arg7: memref<1x128xf32, #tpu.memory_space<vmem>>, %arg8: memref<8x128xf32, #tpu.memory_space<vmem>>) attributes {dimension_semantics = [#tpu.dimension_semantics<parallel>], iteration_bounds = array<i64: 2>, scalar_prefetch = 0 : i64, scratch_operands = 0 : i64, tpu.core_type = #tpu.core_type<tc>, window_params = [{transform_indices = @transform_0, window_bounds = array<i64: 8, 128>}, {pipeline_mode = #tpu.pipeline_mode<synchronous>, transform_indices = @transform_1, window_bounds = array<i64: 128, 128>}, {pipeline_mode = #tpu.pipeline_mode<synchronous>, transform_indices = @transform_2, window_bounds = array<i64: 1, 128>}, {pipeline_mode = #tpu.pipeline_mode<synchronous>, transform_indices = @transform_3, window_bounds = array<i64: 128, 128>}, {pipeline_mode = #tpu.pipeline_mode<synchronous>, transform_indices = @transform_4, window_bounds = array<i64: 1, 128>}, {pipeline_mode = #tpu.pipeline_mode<synchronous>, transform_indices = @transform_5, window_bounds = array<i64: 128, 128>}, {pipeline_mode = #tpu.pipeline_mode<synchronous>, transform_indices = @transform_6, window_bounds = array<i64: 1, 128>}, {transform_indices = @transform_7, window_bounds = array<i64: 8, 128>}]} {
    %c0 = arith.constant 0 : index
    %c0_0 = arith.constant 0 : index
    %0 = vector.load %arg1[%c0, %c0_0] : memref<8x128xf32, #tpu.memory_space<vmem>>, vector<8x128xf32>
    %c0_1 = arith.constant 0 : index
    %c0_2 = arith.constant 0 : index
    %1 = vector.load %arg2[%c0_1, %c0_2] : memref<128x128xbf16, #tpu.memory_space<vmem>>, vector<128x128xbf16>
    %c0_3 = arith.constant 0 : index
    %c0_4 = arith.constant 0 : index
    %2 = vector.load %arg3[%c0_3, %c0_4] : memref<1x128xf32, #tpu.memory_space<vmem>>, vector<1x128xf32>
    %3 = arith.truncf %0 : vector<8x128xf32> to vector<8x128xbf16>
    %cst = arith.constant dense<0.000000e+00> : vector<8x128xf32>
    %4 = tpu.matmul %3, %1, %cst {dimension_numbers = #tpu.dot_dimension_numbers<[1], [0], [0], [1], [0, 0, 1, 1], [], []>} : vector<8x128xbf16>, vector<128x128xbf16>, vector<8x128xf32> -> vector<8x128xf32>
    %5 = vector.broadcast %2 : vector<1x128xf32> to vector<8x128xf32>
    %6 = arith.addf %4, %5 : vector<8x128xf32>
    %cst_5 = arith.constant 0.000000e+00 : f32
    %7 = vector.broadcast %cst_5 : f32 to vector<8x128xf32>
    %8 = arith.maximumf %6, %7 : vector<8x128xf32>
    %c0_6 = arith.constant 0 : index
    %c0_7 = arith.constant 0 : index
    %9 = vector.load %arg4[%c0_6, %c0_7] : memref<128x128xbf16, #tpu.memory_space<vmem>>, vector<128x128xbf16>
    %c0_8 = arith.constant 0 : index
    %c0_9 = arith.constant 0 : index
    %10 = vector.load %arg5[%c0_8, %c0_9] : memref<1x128xf32, #tpu.memory_space<vmem>>, vector<1x128xf32>
    %11 = arith.truncf %8 : vector<8x128xf32> to vector<8x128xbf16>
    %cst_10 = arith.constant dense<0.000000e+00> : vector<8x128xf32>
    %12 = tpu.matmul %11, %9, %cst_10 {dimension_numbers = #tpu.dot_dimension_numbers<[1], [0], [0], [1], [0, 0, 1, 1], [], []>} : vector<8x128xbf16>, vector<128x128xbf16>, vector<8x128xf32> -> vector<8x128xf32>
    %13 = vector.broadcast %10 : vector<1x128xf32> to vector<8x128xf32>
    %14 = arith.addf %12, %13 : vector<8x128xf32>
    %cst_11 = arith.constant 0.000000e+00 : f32
    %15 = vector.broadcast %cst_11 : f32 to vector<8x128xf32>
    %16 = arith.maximumf %14, %15 : vector<8x128xf32>
    %c0_12 = arith.constant 0 : index
    %c0_13 = arith.constant 0 : index
    %17 = vector.load %arg6[%c0_12, %c0_13] : memref<128x128xbf16, #tpu.memory_space<vmem>>, vector<128x128xbf16>
    %c0_14 = arith.constant 0 : index
    %c0_15 = arith.constant 0 : index
    %18 = vector.load %arg7[%c0_14, %c0_15] : memref<1x128xf32, #tpu.memory_space<vmem>>, vector<1x128xf32>
    %19 = arith.truncf %16 : vector<8x128xf32> to vector<8x128xbf16>
    %cst_16 = arith.constant dense<0.000000e+00> : vector<8x128xf32>
    %20 = tpu.matmul %19, %17, %cst_16 {dimension_numbers = #tpu.dot_dimension_numbers<[1], [0], [0], [1], [0, 0, 1, 1], [], []>} : vector<8x128xbf16>, vector<128x128xbf16>, vector<8x128xf32> -> vector<8x128xf32>
    %21 = vector.broadcast %18 : vector<1x128xf32> to vector<8x128xf32>
    %22 = arith.addf %20, %21 : vector<8x128xf32>
    %23 = arith.negf %22 : vector<8x128xf32>
    %24 = math.exp %23 : vector<8x128xf32>
    %cst_17 = arith.constant 1.000000e+00 : f32
    %25 = vector.broadcast %cst_17 : f32 to vector<8x128xf32>
    %26 = arith.addf %25, %24 : vector<8x128xf32>
    %27 = arith.divf %25, %26 : vector<8x128xf32>
    %c0_18 = arith.constant 0 : index
    %c0_19 = arith.constant 0 : index
    %28 = vector.load %arg8[%c0_18, %c0_19] : memref<8x128xf32, #tpu.memory_space<vmem>>, vector<8x128xf32>
    tpu.vector_store %arg8[%c0_18, %c0_19], %27 {strides = array<i32>} : memref<8x128xf32, #tpu.memory_space<vmem>>, vector<8x128xf32>,
    return
  }
  func.func @transform_0(%arg0: i32) -> (i32, i32) {
    %c0_i32 = arith.constant 0 : i32
    %c0_i32_0 = arith.constant 0 : i32
    return %arg0, %c0_i32 : i32, i32
  }
  func.func @transform_1(%arg0: i32) -> (i32, i32) {
    %c0_i32 = arith.constant 0 : i32
    %c0_i32_0 = arith.constant 0 : i32
    %c0_i32_1 = arith.constant 0 : i32
    return %c0_i32, %c0_i32_0 : i32, i32
  }
  func.func @transform_2(%arg0: i32) -> (i32, i32) {
    %c0_i32 = arith.constant 0 : i32
    %c0_i32_0 = arith.constant 0 : i32
    %c0_i32_1 = arith.constant 0 : i32
    return %c0_i32, %c0_i32_0 : i32, i32
  }
  func.func @transform_3(%arg0: i32) -> (i32, i32) {
    %c0_i32 = arith.constant 0 : i32
    %c0_i32_0 = arith.constant 0 : i32
    %c0_i32_1 = arith.constant 0 : i32
    return %c0_i32, %c0_i32_0 : i32, i32
  }
  func.func @transform_4(%arg0: i32) -> (i32, i32) {
    %c0_i32 = arith.constant 0 : i32
    %c0_i32_0 = arith.constant 0 : i32
    %c0_i32_1 = arith.constant 0 : i32
    return %c0_i32, %c0_i32_0 : i32, i32
  }
  func.func @transform_5(%arg0: i32) -> (i32, i32) {
    %c0_i32 = arith.constant 0 : i32
    %c0_i32_0 = arith.constant 0 : i32
    %c0_i32_1 = arith.constant 0 : i32
    return %c0_i32, %c0_i32_0 : i32, i32
  }
  func.func @transform_6(%arg0: i32) -> (i32, i32) {
    %c0_i32 = arith.constant 0 : i32
    %c0_i32_0 = arith.constant 0 : i32
    %c0_i32_1 = arith.constant 0 : i32
    return %c0_i32, %c0_i32_0 : i32, i32
  }
  func.func @transform_7(%arg0: i32) -> (i32, i32) {
    %c0_i32 = arith.constant 0 : i32
    %c0_i32_0 = arith.constant 0 : i32
    return %arg0, %c0_i32 : i32, i32
  }
}

module attributes {stable_mosaic.version = 11 : i64} {
  func.func @_mlp_kernel(%arg0: i32, %arg1: memref<8x128xf32, #tpu.memory_space<vmem>>, %arg2: memref<128x128xbf16, #tpu.memory_space<vmem>>, %arg3: memref<1x128xf32, #tpu.memory_space<vmem>>, %arg4: memref<128x128xbf16, #tpu.memory_space<vmem>>, %arg5: memref<1x128xf32, #tpu.memory_space<vmem>>, %arg6: memref<128x128xbf16, #tpu.memory_space<vmem>>, %arg7: memref<1x128xf32, #tpu.memory_space<vmem>>, %arg8: memref<8x128xf32, #tpu.memory_space<vmem>>) attributes {dimension_semantics = [#tpu.dimension_semantics<parallel>], iteration_bounds = array<i64: 2>, scalar_prefetch = 0 : i64, scratch_operands = 0 : i64, tpu.core_type = #tpu.core_type<tc>, window_params = [{transform_indices = @transform_0, window_bounds = array<i64: 8, 128>}, {pipeline_mode = #tpu.pipeline_mode<synchronous>, transform_indices = @transform_1, window_bounds = array<i64: 128, 128>}, {pipeline_mode = #tpu.pipeline_mode<synchronous>, transform_indices = @transform_2, window_bounds = array<i64: 1, 128>}, {pipeline_mode = #tpu.pipeline_mode<synchronous>, transform_indices = @transform_3, window_bounds = array<i64: 128, 128>}, {pipeline_mode = #tpu.pipeline_mode<synchronous>, transform_indices = @transform_4, window_bounds = array<i64: 1, 128>}, {pipeline_mode = #tpu.pipeline_mode<synchronous>, transform_indices = @transform_5, window_bounds = array<i64: 128, 128>}, {pipeline_mode = #tpu.pipeline_mode<synchronous>, transform_indices = @transform_6, window_bounds = array<i64: 1, 128>}, {transform_indices = @transform_7, window_bounds = array<i64: 8, 128>}]} {
    %c0 = arith.constant 0 : index
    %c0_0 = arith.constant 0 : index
    %0 = vector.load %arg1[%c0, %c0_0] : memref<8x128xf32, #tpu.memory_space<vmem>>, vector<8x128xf32>
    %c0_1 = arith.constant 0 : index
    %c0_2 = arith.constant 0 : index
    %1 = vector.load %arg2[%c0_1, %c0_2] : memref<128x128xbf16, #tpu.memory_space<vmem>>, vector<128x128xbf16>
    %c0_3 = arith.constant 0 : index
    %c0_4 = arith.constant 0 : index
    %2 = vector.load %arg3[%c0_3, %c0_4] : memref<1x128xf32, #tpu.memory_space<vmem>>, vector<1x128xf32>
    %3 = arith.truncf %0 : vector<8x128xf32> to vector<8x128xbf16>
    %cst = arith.constant dense<0.000000e+00> : vector<8x128xf32>
    %4 = tpu.matmul %3, %1, %cst {dimension_numbers = #tpu.dot_dimension_numbers<[1], [0], [0], [1], [0, 0, 1, 1], [], []>} : vector<8x128xbf16>, vector<128x128xbf16>, vector<8x128xf32> -> vector<8x128xf32>
    %5 = vector.broadcast %2 : vector<1x128xf32> to vector<8x128xf32>
    %6 = arith.addf %4, %5 : vector<8x128xf32>
    %cst_5 = arith.constant 0.000000e+00 : f32
    %7 = vector.broadcast %cst_5 : f32 to vector<8x128xf32>
    %8 = arith.maximumf %6, %7 : vector<8x128xf32>
    %c0_6 = arith.constant 0 : index
    %c0_7 = arith.constant 0 : index
    %9 = vector.load %arg4[%c0_6, %c0_7] : memref<128x128xbf16, #tpu.memory_space<vmem>>, vector<128x128xbf16>
    %c0_8 = arith.constant 0 : index
    %c0_9 = arith.constant 0 : index
    %10 = vector.load %arg5[%c0_8, %c0_9] : memref<1x128xf32, #tpu.memory_space<vmem>>, vector<1x128xf32>
    %11 = arith.truncf %8 : vector<8x128xf32> to vector<8x128xbf16>
    %cst_10 = arith.constant dense<0.000000e+00> : vector<8x128xf32>
    %12 = tpu.matmul %11, %9, %cst_10 {dimension_numbers = #tpu.dot_dimension_numbers<[1], [0], [0], [1], [0, 0, 1, 1], [], []>} : vector<8x128xbf16>, vector<128x128xbf16>, vector<8x128xf32> -> vector<8x128xf32>
    %13 = vector.broadcast %10 : vector<1x128xf32> to vector<8x128xf32>
    %14 = arith.addf %12, %13 : vector<8x128xf32>
    %cst_11 = arith.constant 0.000000e+00 : f32
    %15 = vector.broadcast %cst_11 : f32 to vector<8x128xf32>
    %16 = arith.maximumf %14, %15 : vector<8x128xf32>
    %c0_12 = arith.constant 0 : index
    %c0_13 = arith.constant 0 : index
    %17 = vector.load %arg6[%c0_12, %c0_13] : memref<128x128xbf16, #tpu.memory_space<vmem>>, vector<128x128xbf16>
    %c0_14 = arith.constant 0 : index
    %c0_15 = arith.constant 0 : index
    %18 = vector.load %arg7[%c0_14, %c0_15] : memref<1x128xf32, #tpu.memory_space<vmem>>, vector<1x128xf32>
    %19 = arith.truncf %16 : vector<8x128xf32> to vector<8x128xbf16>
    %cst_16 = arith.constant dense<0.000000e+00> : vector<8x128xf32>
    %20 = tpu.matmul %19, %17, %cst_16 {dimension_numbers = #tpu.dot_dimension_numbers<[1], [0], [0], [1], [0, 0, 1, 1], [], []>} : vector<8x128xbf16>, vector<128x128xbf16>, vector<8x128xf32> -> vector<8x128xf32>
    %21 = vector.broadcast %18 : vector<1x128xf32> to vector<8x128xf32>
    %22 = arith.addf %20, %21 : vector<8x128xf32>
    %23 = arith.negf %22 : vector<8x128xf32>
    %24 = math.exp %23 : vector<8x128xf32>
    %cst_17 = arith.constant 1.000000e+00 : f32
    %25 = vector.broadcast %cst_17 : f32 to vector<8x128xf32>
    %26 = arith.addf %25, %24 : vector<8x128xf32>
    %27 = arith.divf %25, %26 : vector<8x128xf32>
    %c0_18 = arith.constant 0 : index
    %c0_19 = arith.constant 0 : index
    %28 = vector.load %arg8[%c0_18, %c0_19] : memref<8x128xf32, #tpu.memory_space<vmem>>, vector<8x128xf32>
    tpu.vector_store %arg8[%c0_18, %c0_19], %27 {strides = array<i32>} : memref<8x128xf32, #tpu.memory_space<vmem>>, vector<8x128xf32>,
    return
  }
  func.func @transform_0(%arg0: i32) -> (i32, i32) {
    %c0_i32 = arith.constant 0 : i32
    %c0_i32_0 = arith.constant 0 : i32
    return %arg0, %c0_i32 : i32, i32
  }
  func.func @transform_1(%arg0: i32) -> (i32, i32) {
    %c0_i32 = arith.constant 0 : i32
    %c0_i32_0 = arith.constant 0 : i32
    %c0_i32_1 = arith.constant 0 : i32
    return %c0_i32, %c0_i32_0 : i32, i32
  }
  func.func @transform_2(%arg0: i32) -> (i32, i32) {
    %c0_i32 = arith.constant 0 : i32
    %c0_i32_0 = arith.constant 0 : i32
    %c0_i32_1 = arith.constant 0 : i32
    return %c0_i32, %c0_i32_0 : i32, i32
  }
  func.func @transform_3(%arg0: i32) -> (i32, i32) {
    %c0_i32 = arith.constant 0 : i32
    %c0_i32_0 = arith.constant 0 : i32
    %c0_i32_1 = arith.constant 0 : i32
    return %c0_i32, %c0_i32_0 : i32, i32
  }
  func.func @transform_4(%arg0: i32) -> (i32, i32) {
    %c0_i32 = arith.constant 0 : i32
    %c0_i32_0 = arith.constant 0 : i32
    %c0_i32_1 = arith.constant 0 : i32
    return %c0_i32, %c0_i32_0 : i32, i32
  }
  func.func @transform_5(%arg0: i32) -> (i32, i32) {
    %c0_i32 = arith.constant 0 : i32
    %c0_i32_0 = arith.constant 0 : i32
    %c0_i32_1 = arith.constant 0 : i32
    return %c0_i32, %c0_i32_0 : i32, i32
  }
  func.func @transform_6(%arg0: i32) -> (i32, i32) {
    %c0_i32 = arith.constant 0 : i32
    %c0_i32_0 = arith.constant 0 : i32
    %c0_i32_1 = arith.constant 0 : i32
    return %c0_i32, %c0_i32_0 : i32, i32
  }
  func.func @transform_7(%arg0: i32) -> (i32, i32) {
    %c0_i32 = arith.constant 0 : i32
    %c0_i32_0 = arith.constant 0 : i32
    return %arg0, %c0_i32 : i32, i32
  }
}

</mosaic_0001>

<bundles_post_ra>
// kernel: tpu_custom_call.1
= control target key start
LH: loop header
LB: loop body
LE: loop exit
PB: predicated region body
PF: predicated region fallthrough
CT: control target
= control target key end

     0   :  { %s1368_s0 = inlined_call_operand.hbm [shape: f32[16,128], index: 0, kind: input, shape index: {}]   ;;  %s1369_s1 = inlined_call_operand.hbm [shape: bf16[128,128], index: 1, kind: input, shape index: {}]   ;;  %s1370_s2 = inlined_call_operand.vmem [shape: f32[1,128], index: 2, kind: input, shape index: {}]   ;;  %s1371_s3 = inlined_call_operand.hbm [shape: bf16[128,128], index: 3, kind: input, shape index: {}]   ;;  %s1372_s4 = inlined_call_operand.vmem [shape: f32[1,128], index: 4, kind: input, shape index: {}]   ;;  %s1373_s5 = inlined_call_operand.hbm [shape: bf16[128,128], index: 5, kind: input, shape index: {}]   ;;  %s1374_s6 = inlined_call_operand.vmem [shape: f32[1,128], index: 6, kind: input, shape index: {}]   ;;  %s1375_s7 = inlined_call_operand.hbm [shape: f32[16,128], index: 7, kind: output, shape index: {}]  }
   0x1   :  { %1376 = sst [smem:[#allocation15_spill]] %s1369_s1 }
   0x2   :  { %12 = vsyncpa [#allocation3], 0 }
   0x3   :  { %14 = vsyncpa [#allocation3 + $0x1], 0 }
   0x4   :  { %15 = vsyncpa [#allocation6], 0 }
   0x5   :  { %16 = vsyncpa [#allocation9], 0 }
   0x6   :  { %17 = vsyncpa [#allocation4], 0 }
   0x7   :  { %19 = vsyncpa [#allocation4 + $0x1], 0  ;;  %s1196_s24 = smov 0   ;;  %s1198_s25 = smov 0  }
   0x8   :  { %s1200_s26 = smov 0   ;;  %s1202_s27 = smov 0  }
   0x9 LB: > { %s1377_s1 = sld [smem:[#allocation15_spill]]  ;;  %s1220_s8 = sadd.s32 4294967295, %s1149_s27   ;;  %s1149_s27 = sphi %s1202_s27, %s1388_s27   ;;  %s1145_s26 = sphi %s1200_s26, %s1387_s26   ;;  %s1141_s25 = sphi %s1198_s25, %s1386_s25   ;;  %s1137_s24 = sphi %s1196_s24, %s1385_s24  }
   0xa   : > { %p731_p0 = scmp.ge.s32.totalorder %s1149_s27, 1  ;;  %p46_p1 = scmp.eq.s32.totalorder %s1220_s8, 0 }
   0xb   : > { %p208_p2 = scmp.lt.s32.totalorder %s1149_s27, 3  ;;  %s1151_s10 = smov [#allocation5]  }
   0xc   : > { %s221_s11 = sshll.u32 %s1151_s10, 4  ;;  %s236_s14 = sshll.u32 %s1371_s3, 4  ;;  %s222_s11 = int_to_ptr.vmem [resolvable:$true] %s221_s11  ;;  %s237_s14 = int_to_ptr.hbm [resolvable:$true] %s236_s14 }
   0xd   : > { %p1225_p3 = pnand %p731_p0, %p208_p2  ;;  %s253_s18 = sshll.u32 %s1373_s5, 4  ;;  %s254_s18 = int_to_ptr.hbm [resolvable:$true] %s253_s18 }
   0xe   : > { %s1152_s19 = smov [#allocation7]   ;;  %s1153_s21 = smov 64  }
   0xf   : > { %s219_s30 = sshll.u32 %s1377_s1, 4  ;;  %p885_p4 = pneg %p1225_p3  ;;  %s220_s30 = int_to_ptr.hbm [resolvable:$true] %s219_s30 }
  0x10   : > { %s238_s20 = sshll.u32 %s1152_s19, 4  ;;  %s1154_s22 = smov 4   ;;  %s239_s20 = int_to_ptr.vmem [resolvable:$true] %s238_s20 }
  0x11   : > { %p1237_p6 = pnand %p885_p4, %p46_p1  ;;  %s1155_s23 = smov [#allocation8]  }
  0x12   : > { %s255_s28 = sshll.u32 %s1155_s23, 4  ;;  %s730_s29 = sadd.s32 4294967294, %s1149_s27   ;;  %s256_s28 = int_to_ptr.vmem [resolvable:$true] %s255_s28 }
  0x13   : > { %888 = dma.hbm_to_vmem [thread:$0]  (!%p1237_p6), %s220_s30, 1024, %s222_s11, [#allocation6], %s1153_s21, %s1153_s21, %s1154_s22  }
  0x14   : > { %891 = dma.hbm_to_vmem [thread:$0]  (!%p1237_p6), %s237_s14, 1024, %s239_s20, [#allocation6], %s1153_s21, %s1153_s21, %s1154_s22  }
  0x15   : > { %894 = dma.hbm_to_vmem [thread:$0]  (!%p1237_p6), %s254_s18, 1024, %s256_s28, [#allocation9], %s1153_s21, %s1153_s21, %s1154_s22  }
  0x16   : > { %s1252_s10 = sadd.s32 1, %s1149_s27   ;;  %s32_s12 = sadd.s32 1, %s1145_s26 }
  0x17   : > { %s29_s30 = ssub.s32 %s1149_s27, %s1252_s10  ;;  %p39_p7 = scmp.ne.s32.totalorder %s1145_s26, %s1141_s25 }
  0x18   : > { %p30_p8 = scmp.eq.s32.totalorder %s29_s30, 0  ;;  %p40_p9 = scmp.eq.s32.totalorder %s1149_s27, 0 }
  0x19   : > { %p45_p10 = scmp.ne.s32.totalorder %s1141_s25, %s1137_s24  ;;  %p195_p11 = scmp.eq.s32.totalorder %s1220_s8, 1 }
  0x1a   : > { %s1264_s11 = scalar_select %p30_p8, %s1145_s26, %s32_s12  }
  0x1b   : > { %p1268_p12 = por %p46_p1, %p45_p10  ;;  %p1272_p13 = por %p195_p11, %p39_p7 }
  0x1c   : > { %p201_p0 = scmp.eq.s32.totalorder %s730_s29, 1  ;;  %p41_p2 = por %p40_p9, %p39_p7 }
  0x1d   : > { %s272_s15 = sand.u32 1, %s1145_s26   ;;  %p906_p6 = scmp.lt.s32.totalorder %s1149_s27, 2 }
  0x1e   : > { %p1277_p4 = por %p201_p0, %p45_p10  ;;  %s736_s17 = sshll.u32 %s272_s15, 3 }
  0x1f   : > { %s737_s18 = sshll.u32 %s1149_s27, 3  ;;  %s276_s23 = scalar_lea.vmem [#allocation2], %s736_s17 }
  0x20   : > { %s280_s21 = scalar_lea.hbm %s1368_s0, %s737_s18  ;;  %s284_s28 = sshll.u32 %s276_s23, 4  ;;  %s285_s28 = int_to_ptr.vmem [resolvable:$true] %s284_s28 }
  0x21   : > { %s282_s22 = sshll.u32 %s280_s21, 4  ;;  %p1286_p8 = pnand %p906_p6, %p41_p2  ;;  %s283_s22 = int_to_ptr.hbm [resolvable:$true] %s282_s22 }
  0x22   : > { %s273_s12 = scalar_lea.sflag [#allocation3], %s272_s15  ;;  %s1045_s30 = sshra.s32 %s283_s22, 4  ;;  %s1046_s30 = int_to_ptr.hbm [resolvable:$true] %s1045_s30 }
  0x23   : > { %s1047_s1 = scalar_lea.hbm %s1046_s30, 8  ;;  %p1049_p9 = pneg %p1286_p8 }
  0x24   : > { %p1048_p7 = scmp.ne.s32.totalorder %s1046_s30, %s1047_s1  ;;  %s1052_s17 = scalar_lea.hbm %s1368_s0, 16 }
  0x25   : > { %p1053_p0 = scmp.lt.s32.totalorder %s1046_s30, %s1368_s0  ;;  %p1054_p2 = scmp.lt.s32.totalorder %s1052_s17, %s1047_s1 }
  0x26   : > { %p1050_p10 = pnand %p1049_p9, %p1048_p7 }
  0x27   : > { %p1055_p6 = por %p1054_p2, %p1053_p0 }
  0x28   : > { %p1051_p11 = pneg %p1050_p10 }
  0x2a   : > { %p1056_p5 = pnand %p1055_p6, %p1051_p11 }
  0x2c   : > { %1059 = shalt.err (!%p1056_p5)
}
  0x2d   : > { %898 = dma.hbm_to_vmem [thread:$0]  (!%p1286_p8), %s283_s22, 128, %s285_s28, %s273_s12  }
  0x2e   : > { %293 = sbr.rel (%p1225_p3) target bundleno = 517 (0x205), region = 48  ;;  %s1303_s15 = sand.u32 (!%p1225_p3), 1, %s1141_s25  }
  0x2f   : > { %s739_s23 = sshll.u32 (!%p1225_p3), %s1303_s15, 3  ;;  %s296_s18 = scalar_lea.sflag (!%p1225_p3), [#allocation3], %s1303_s15 }
  0x30   : > { %s1309_s1 = scalar_lea.vmem (!%p1225_p3), [#allocation2], %s739_s23 }
  0x33   : > { %1120 = dma.done.wait (%p1268_p12), %s296_s18, 128  }
  0x34   : > { %1122 = vsyncadd (%p1268_p12), %s296_s18, 4294967168 }
  0x35   : > { %1124 = dma.done.wait (%p46_p1), [#allocation6], 2048  }
  0x36   : > { %1126 = vsyncadd (%p46_p1), [#allocation6], 4294965248 }
  0x37   : > { %1128 = dma.done.wait (%p46_p1), [#allocation9], 1024  }
  0x38   : > { %1130 = vsyncadd (%p46_p1), [#allocation9], 4294966272  ;;  %v852_v0 = vld [vmem:[#allocation5 + $0x38] sm:$0xff]  ;;  %v851_v1 = vld [vmem:[#allocation5 + $0x30] sm:$0xff]  ;;  %s842_s30 = sshll.u32 %s1220_s8, 3  ;;  %s345_s21 = scalar_lea.vmem [#allocation10], %s739_s23 }
  0x39   : > { %416 = vmatpush.bf16.msra.mxu0 %v852_v0  ;;  %v860_v2 = vld [vmem:[#allocation7 + $0x38] sm:$0xff]  ;;  %v859_v3 = vld [vmem:[#allocation7 + $0x30] sm:$0xff]  ;;  %v850_v4 = vld [vmem:[#allocation5 + $0x28] sm:$0xff]  ;;  %s626_s20 = scalar_lea.hbm %s1375_s7, %s842_s30  ;;  %s628_s18 = sshll.u32 %s345_s21, 4  ;;  %s629_s18 = int_to_ptr.vmem [resolvable:$true] %s628_s18 }
  0x3a   : > { %499 = vmatpush.bf16.msra.mxu1 %v860_v2  ;;  %v858_v5 = vld [vmem:[#allocation7 + $0x28] sm:$0xff]  ;;  %v849_v6 = vld [vmem:[#allocation5 + $0x20] sm:$0xff]  ;;  %v848_v8 = vld [vmem:[#allocation5 + $0x18] sm:$0xff]  ;;  %s616_s8 = scalar_lea.sflag [#allocation4], %s1303_s15  ;;  %s1095_s28 = scalar_lea.hbm %s1375_s7, 16 }
  0x3b   : > { %v857_v7 = vld [vmem:[#allocation7 + $0x20] sm:$0xff]  ;;  %v856_v9 = vld [vmem:[#allocation7 + $0x18] sm:$0xff]  ;;  %v847_v10 = vld [vmem:[#allocation5 + $0x10] sm:$0xff] }
  0x3c   : > { %v855_v11 = vld [vmem:[#allocation7 + $0x10] sm:$0xff]  ;;  %v846_v12 = vld [vmem:[#allocation5 + $0x8] sm:$0xff]  ;;  %v845_v13 = vld [vmem:[#allocation5] sm:$0xff] }
  0x3d   : > { %417 = vmatpush.bf16.msra.mxu0 %v851_v1  ;;  %v346_v14 = vld [vmem:[%s1309_s1] sm:$0xff]  ;;  %v854_v16 = vld [vmem:[#allocation7 + $0x8] sm:$0xff]  ;;  %v853_v17 = vld [vmem:[#allocation7] sm:$0xff]  ;;  %s630_s1 = sshll.u32 %s626_s20, 4  ;;  %s631_s1 = int_to_ptr.hbm [resolvable:$true] %s630_s1 }
  0x3e   : > { %500 = vmatpush.bf16.msra.mxu1 %v859_v3  ;;  %v364_v15 = vpack.c.bf16 %v346_v14, %v346_v14  ;;  %v868_v18 = vld [vmem:[#allocation8 + $0x38] sm:$0xff]  ;;  %v867_v19 = vld [vmem:[#allocation8 + $0x30] sm:$0xff]  ;;  %v866_v20 = vld [vmem:[#allocation8 + $0x28] sm:$0xff]  ;;  %s1089_s9 = sshra.s32 %s631_s1, 4  ;;  %s1090_s9 = int_to_ptr.hbm [resolvable:$true] %s1089_s9 }
  0x3f   : > { %582 = vmatpush.bf16.msra.mxu2 %v868_v18  ;;  %v865_v21 = vld [vmem:[#allocation8 + $0x20] sm:$0xff]  ;;  %v864_v22 = vld [vmem:[#allocation8 + $0x18] sm:$0xff]  ;;  %v863_v23 = vld [vmem:[#allocation8 + $0x10] sm:$0xff]  ;;  %s1091_s13 = scalar_lea.hbm %s1090_s9, 8  ;;  %p1096_p12 = scmp.lt.s32.totalorder %s1090_s9, %s1375_s7 }
  0x40   : > { %v948_v24 = vld [vmem:[%s1370_s2] ss:$0 sm:$0xff]  ;;  %v862_v30 = vld [vmem:[#allocation8 + $0x8] sm:$0xff]  ;;  %v861_v31 = vld [vmem:[#allocation8] sm:$0xff]  ;;  %p1092_p1 = scmp.ne.s32.totalorder %s1090_s9, %s1091_s13  ;;  %p1097_p8 = scmp.lt.s32.totalorder %s1095_s28, %s1091_s13 }
  0x41   : > { %418 = vmatpush.bf16.msra.mxu0 %v850_v4  ;;  %v949_v32 = vld [vmem:[%s1372_s4] ss:$0 sm:$0xff] }
  0x42   : > { %501 = vmatpush.bf16.msra.mxu1 %v858_v5  ;;  %v950_v38 = vld [vmem:[%s1374_s6] ss:$0 sm:$0xff]  ;;  %p1093_p3 = pnand %p1092_p1, %p1272_p13  ;;  %p1098_p7 = por %p1097_p8, %p1096_p12 }
  0x43   : > { %583 = vmatpush.bf16.msra.mxu2 %v867_v19 }
  0x44   : > { %p1094_p5 = pneg %p1093_p3 }
  0x45   : > { %419 = vmatpush.bf16.msra.mxu0 %v849_v6 }
  0x46   : > { %502 = vmatpush.bf16.msra.mxu1 %v857_v7  ;;  %p1099_p9 = pnand %p1098_p7, %p1094_p5 }
  0x47   : > { %584 = vmatpush.bf16.msra.mxu2 %v866_v20 }
  0x49   : > { %420 = vmatpush.bf16.msra.mxu0 %v848_v8 }
  0x4a   : > { %503 = vmatpush.bf16.msra.mxu1 %v856_v9 }
  0x4b   : > { %585 = vmatpush.bf16.msra.mxu2 %v865_v21 }
  0x4d   : > { %421 = vmatpush.bf16.msra.mxu0 %v847_v10 }
  0x4e   : > { %504 = vmatpush.bf16.msra.mxu1 %v855_v11 }
  0x4f   : > { %586 = vmatpush.bf16.msra.mxu2 %v864_v22 }
  0x51   : > { %422 = vmatpush.bf16.msra.mxu0 %v846_v12 }
  0x52   : > { %505 = vmatpush.bf16.msra.mxu1 %v854_v16 }
  0x53   : > { %587 = vmatpush.bf16.msra.mxu2 %v863_v23 }
  0x55   : > { %423 = vmatpush.bf16.msra.mxu0 %v845_v13 }
  0x56   : > { %506 = vmatpush.bf16.msra.mxu1 %v853_v17 }
  0x57   : > { %588 = vmatpush.bf16.msra.mxu2 %v862_v30 }
  0x58   : > { %424 = vmatmul.bf16.vlgmr.msra.gmra.mxu0 %v364_v15 }
  0x5b   : > { %589 = vmatpush.bf16.msra.mxu2 %v861_v31 }
  0xd5   : > { %v425_v25 = vpop.f32.mrf.mxu0 }
  0xd6   : > { %v426_v26 = vadd.f32 %v948_v24, %v425_v25 }
  0xd8   : > { %v429_v27 = vmax.f32 %v426_v26, 0.0 }
  0xda   : > { %v447_v28 = vpack.c.bf16 %v429_v27, %v429_v27 }
  0xdc   : > { %507 = vmatmul.bf16.vlgmr.msra.gmra.mxu1 %v447_v28 }
  0xdd   : > { %v427_v29 = vpop.f32.mrf.mxu0 }
 0x159   : > { %v508_v33 = vpop.f32.mrf.mxu1 }
 0x15a   : > { %v509_v34 = vadd.f32 %v949_v32, %v508_v33 }
 0x15c   : > { %v512_v35 = vmax.f32 %v509_v34, 0.0 }
 0x15e   : > { %v530_v36 = vpack.c.bf16 %v512_v35, %v512_v35 }
 0x160   : > { %590 = vmatmul.bf16.vlgmr.msra.gmra.mxu2 %v530_v36 }
 0x161   : > { %v510_v37 = vpop.f32.mrf.mxu1 }
 0x1e3   : > { %v591_v39 = vpop.f32.mrf.mxu2 }
 0x1e4   : > { %v592_v40 = vadd.f32 %v950_v38, %v591_v39 }
 0x1e6   : > { %v840_v41 = vmul.f32 -1.442695, %v592_v40 }
 0x1e8   : > { %951 = vpow2.f32 %v840_v41 }
 0x1eb   : > { %v593_v42 = vpop.f32.mrf.mxu2 }
 0x1ee   : > { %v952_v43 = vpop.eup %951 }
 0x1ef   : > { %v598_v44 = vadd.f32 1.0, %v952_v43 }
 0x1f1   : > { %953 = vrcp.f32 %v598_v44  ;;  %v610_v48 = vand.u32 2147483648, %v598_v44  ;;  %v608_v50 = vand.u32 2147483647, %v598_v44  ;;  %vm604_vm1 = vweird.f32 %v598_v44 }
 0x1f3   : > { %v611_v52 = vor.u32 1.1754944e-38, %v610_v48  ;;  %vm609_vm3 = vcmp.eq.f32.partialorder %v608_v50, 8.507059e+37 }
 0x1f7   : > { %v954_v45 = vpop.eup %953 }
 0x1f8   : > { %v600_v46 = vmul.f32 %v954_v45, %v598_v44  ;;  %vm605_vm0 = vweird.f32 %v954_v45 }
 0x1f9   : > { %vm606_vm2 = vmor %vm604_vm1, %vm605_vm0 }
 0x1fa   : > { %v601_v47 = vsub.f32 1.0, %v600_v46 }
 0x1fc   : > { %v602_v49 = vmul.f32 %v954_v45, %v601_v47 }
 0x1fe   : > { %v603_v51 = vadd.f32 %v954_v45, %v602_v49 }
 0x200   : > { %v607_v53 = vsel %vm606_vm2, %v954_v45, %v603_v51 }
 0x201   : > { %v612_v54 = vsel %vm609_vm3, %v611_v52, %v607_v53 }
 0x202   : > { %614 = vst [vmem:[%s345_s21] sm:$0xff] %v612_v54 }
 0x203   : > { %1102 = shalt.err (!%p1099_p9)
}
 0x204   : > { %883 = dma.vmem_to_hbm [thread:$0]  (%p1272_p13), %s629_s18, 128, %s631_s1, %s616_s8  }
 0x205 PF: > { %s642_s15 = sand.u32 1, %s1137_s24   ;;  %p1384_p10 = scmp.ge.s32.totalorder %s1149_s27, 2 }
 0x206   : > { %s643_s30 = scalar_lea.sflag [#allocation4], %s642_s15 }
 0x207   : > { %p900_p11 = pnand %p1384_p10, %p1277_p4 }
 0x209   : > { %p901_p0 = pneg %p900_p11 }
 0x20b   : > { %1132 = dma.done.wait (%p901_p0), %s643_s30, 128  }
 0x20c   : > { %1134 = vsyncadd (%p901_p0), %s643_s30, 4294967168  ;;  %p22_p2 = scmp.ge.s32.totalorder %s1252_s10, 4   ;;  %s1385_s24 = smov %s1141_s25 }
 0x20d   : > { %s1386_s25 = smov %s1145_s26  ;;  %s1387_s26 = smov %s1264_s11 }
 0x20e   : > { %s1388_s27 = smov %s1252_s10  ;;  %24 = sbr.rel (!%p22_p2) target bundleno = 9 (0x9), region = 105 }
 0x213   :  { %649 = vsyncpa [#allocation3], 1 }
 0x214   :  { %651 = vsyncpa [#allocation3 + $0x1], 1 }
 0x215   :  { %652 = vsyncpa [#allocation6], 1 }
 0x216   :  { %653 = vsyncpa [#allocation9], 1 }
 0x217   :  { %654 = vsyncpa [#allocation4], 1 }
 0x218   :  { %656 = vsyncpa [#allocation4 + $0x1], 1 }

// kernel: tpu_custom_call.1
= control target key start
LH: loop header
LB: loop body
LE: loop exit
PB: predicated region body
PF: predicated region fallthrough
CT: control target
= control target key end

     0   :  { %s1368_s0 = inlined_call_operand.hbm [shape: f32[16,128], index: 0, kind: input, shape index: {}]   ;;  %s1369_s1 = inlined_call_operand.hbm [shape: bf16[128,128], index: 1, kind: input, shape index: {}]   ;;  %s1370_s2 = inlined_call_operand.vmem [shape: f32[1,128], index: 2, kind: input, shape index: {}]   ;;  %s1371_s3 = inlined_call_operand.hbm [shape: bf16[128,128], index: 3, kind: input, shape index: {}]   ;;  %s1372_s4 = inlined_call_operand.vmem [shape: f32[1,128], index: 4, kind: input, shape index: {}]   ;;  %s1373_s5 = inlined_call_operand.hbm [shape: bf16[128,128], index: 5, kind: input, shape index: {}]   ;;  %s1374_s6 = inlined_call_operand.vmem [shape: f32[1,128], index: 6, kind: input, shape index: {}]   ;;  %s1375_s7 = inlined_call_operand.hbm [shape: f32[16,128], index: 7, kind: output, shape index: {}]  }
   0x1   :  { %1376 = sst [smem:[#allocation15_spill]] %s1369_s1 }
   0x2   :  { %12 = vsyncpa [#allocation3], 0 }
   0x3   :  { %14 = vsyncpa [#allocation3 + $0x1], 0 }
   0x4   :  { %15 = vsyncpa [#allocation6], 0 }
   0x5   :  { %16 = vsyncpa [#allocation9], 0 }
   0x6   :  { %17 = vsyncpa [#allocation4], 0 }
   0x7   :  { %19 = vsyncpa [#allocation4 + $0x1], 0  ;;  %s1196_s24 = smov 0   ;;  %s1198_s25 = smov 0  }
   0x8   :  { %s1200_s26 = smov 0   ;;  %s1202_s27 = smov 0  }
   0x9 LB: > { %s1377_s1 = sld [smem:[#allocation15_spill]]  ;;  %s1220_s8 = sadd.s32 4294967295, %s1149_s27   ;;  %s1149_s27 = sphi %s1202_s27, %s1388_s27   ;;  %s1145_s26 = sphi %s1200_s26, %s1387_s26   ;;  %s1141_s25 = sphi %s1198_s25, %s1386_s25   ;;  %s1137_s24 = sphi %s1196_s24, %s1385_s24  }
   0xa   : > { %p731_p0 = scmp.ge.s32.totalorder %s1149_s27, 1  ;;  %p46_p1 = scmp.eq.s32.totalorder %s1220_s8, 0 }
   0xb   : > { %p208_p2 = scmp.lt.s32.totalorder %s1149_s27, 3  ;;  %s1151_s10 = smov [#allocation5]  }
   0xc   : > { %s221_s11 = sshll.u32 %s1151_s10, 4  ;;  %s236_s14 = sshll.u32 %s1371_s3, 4  ;;  %s222_s11 = int_to_ptr.vmem [resolvable:$true] %s221_s11  ;;  %s237_s14 = int_to_ptr.hbm [resolvable:$true] %s236_s14 }
   0xd   : > { %p1225_p3 = pnand %p731_p0, %p208_p2  ;;  %s253_s18 = sshll.u32 %s1373_s5, 4  ;;  %s254_s18 = int_to_ptr.hbm [resolvable:$true] %s253_s18 }
   0xe   : > { %s1152_s19 = smov [#allocation7]   ;;  %s1153_s21 = smov 64  }
   0xf   : > { %s219_s30 = sshll.u32 %s1377_s1, 4  ;;  %p885_p4 = pneg %p1225_p3  ;;  %s220_s30 = int_to_ptr.hbm [resolvable:$true] %s219_s30 }
  0x10   : > { %s238_s20 = sshll.u32 %s1152_s19, 4  ;;  %s1154_s22 = smov 4   ;;  %s239_s20 = int_to_ptr.vmem [resolvable:$true] %s238_s20 }
  0x11   : > { %p1237_p6 = pnand %p885_p4, %p46_p1  ;;  %s1155_s23 = smov [#allocation8]  }
  0x12   : > { %s255_s28 = sshll.u32 %s1155_s23, 4  ;;  %s730_s29 = sadd.s32 4294967294, %s1149_s27   ;;  %s256_s28 = int_to_ptr.vmem [resolvable:$true] %s255_s28 }
  0x13   : > { %888 = dma.hbm_to_vmem [thread:$0]  (!%p1237_p6), %s220_s30, 1024, %s222_s11, [#allocation6], %s1153_s21, %s1153_s21, %s1154_s22  }
  0x14   : > { %891 = dma.hbm_to_vmem [thread:$0]  (!%p1237_p6), %s237_s14, 1024, %s239_s20, [#allocation6], %s1153_s21, %s1153_s21, %s1154_s22  }
  0x15   : > { %894 = dma.hbm_to_vmem [thread:$0]  (!%p1237_p6), %s254_s18, 1024, %s256_s28, [#allocation9], %s1153_s21, %s1153_s21, %s1154_s22  }
  0x16   : > { %s1252_s10 = sadd.s32 1, %s1149_s27   ;;  %s32_s12 = sadd.s32 1, %s1145_s26 }
  0x17   : > { %s29_s30 = ssub.s32 %s1149_s27, %s1252_s10  ;;  %p39_p7 = scmp.ne.s32.totalorder %s1145_s26, %s1141_s25 }
  0x18   : > { %p30_p8 = scmp.eq.s32.totalorder %s29_s30, 0  ;;  %p40_p9 = scmp.eq.s32.totalorder %s1149_s27, 0 }
  0x19   : > { %p45_p10 = scmp.ne.s32.totalorder %s1141_s25, %s1137_s24  ;;  %p195_p11 = scmp.eq.s32.totalorder %s1220_s8, 1 }
  0x1a   : > { %s1264_s11 = scalar_select %p30_p8, %s1145_s26, %s32_s12  }
  0x1b   : > { %p1268_p12 = por %p46_p1, %p45_p10  ;;  %p1272_p13 = por %p195_p11, %p39_p7 }
  0x1c   : > { %p201_p0 = scmp.eq.s32.totalorder %s730_s29, 1  ;;  %p41_p2 = por %p40_p9, %p39_p7 }
  0x1d   : > { %s272_s15 = sand.u32 1, %s1145_s26   ;;  %p906_p6 = scmp.lt.s32.totalorder %s1149_s27, 2 }
  0x1e   : > { %p1277_p4 = por %p201_p0, %p45_p10  ;;  %s736_s17 = sshll.u32 %s272_s15, 3 }
  0x1f   : > { %s737_s18 = sshll.u32 %s1149_s27, 3  ;;  %s276_s23 = scalar_lea.vmem [#allocation2], %s736_s17 }
  0x20   : > { %s280_s21 = scalar_lea.hbm %s1368_s0, %s737_s18  ;;  %s284_s28 = sshll.u32 %s276_s23, 4  ;;  %s285_s28 = int_to_ptr.vmem [resolvable:$true] %s284_s28 }
  0x21   : > { %s282_s22 = sshll.u32 %s280_s21, 4  ;;  %p1286_p8 = pnand %p906_p6, %p41_p2  ;;  %s283_s22 = int_to_ptr.hbm [resolvable:$true] %s282_s22 }
  0x22   : > { %s273_s12 = scalar_lea.sflag [#allocation3], %s272_s15  ;;  %s1045_s30 = sshra.s32 %s283_s22, 4  ;;  %s1046_s30 = int_to_ptr.hbm [resolvable:$true] %s1045_s30 }
  0x23   : > { %s1047_s1 = scalar_lea.hbm %s1046_s30, 8  ;;  %p1049_p9 = pneg %p1286_p8 }
  0x24   : > { %p1048_p7 = scmp.ne.s32.totalorder %s1046_s30, %s1047_s1  ;;  %s1052_s17 = scalar_lea.hbm %s1368_s0, 16 }
  0x25   : > { %p1053_p0 = scmp.lt.s32.totalorder %s1046_s30, %s1368_s0  ;;  %p1054_p2 = scmp.lt.s32.totalorder %s1052_s17, %s1047_s1 }
  0x26   : > { %p1050_p10 = pnand %p1049_p9, %p1048_p7 }
  0x27   : > { %p1055_p6 = por %p1054_p2, %p1053_p0 }
  0x28   : > { %p1051_p11 = pneg %p1050_p10 }
  0x2a   : > { %p1056_p5 = pnand %p1055_p6, %p1051_p11 }
  0x2c   : > { %1059 = shalt.err (!%p1056_p5)
}
  0x2d   : > { %898 = dma.hbm_to_vmem [thread:$0]  (!%p1286_p8), %s283_s22, 128, %s285_s28, %s273_s12  }
  0x2e   : > { %293 = sbr.rel (%p1225_p3) target bundleno = 517 (0x205), region = 48  ;;  %s1303_s15 = sand.u32 (!%p1225_p3), 1, %s1141_s25  }
  0x2f   : > { %s739_s23 = sshll.u32 (!%p1225_p3), %s1303_s15, 3  ;;  %s296_s18 = scalar_lea.sflag (!%p1225_p3), [#allocation3], %s1303_s15 }
  0x30   : > { %s1309_s1 = scalar_lea.vmem (!%p1225_p3), [#allocation2], %s739_s23 }
  0x33   : > { %1120 = dma.done.wait (%p1268_p12), %s296_s18, 128  }
  0x34   : > { %1122 = vsyncadd (%p1268_p12), %s296_s18, 4294967168 }
  0x35   : > { %1124 = dma.done.wait (%p46_p1), [#allocation6], 2048  }
  0x36   : > { %1126 = vsyncadd (%p46_p1), [#allocation6], 4294965248 }
  0x37   : > { %1128 = dma.done.wait (%p46_p1), [#allocation9], 1024  }
  0x38   : > { %1130 = vsyncadd (%p46_p1), [#allocation9], 4294966272  ;;  %v852_v0 = vld [vmem:[#allocation5 + $0x38] sm:$0xff]  ;;  %v851_v1 = vld [vmem:[#allocation5 + $0x30] sm:$0xff]  ;;  %s842_s30 = sshll.u32 %s1220_s8, 3  ;;  %s345_s21 = scalar_lea.vmem [#allocation10], %s739_s23 }
  0x39   : > { %416 = vmatpush.bf16.msra.mxu0 %v852_v0  ;;  %v860_v2 = vld [vmem:[#allocation7 + $0x38] sm:$0xff]  ;;  %v859_v3 = vld [vmem:[#allocation7 + $0x30] sm:$0xff]  ;;  %v850_v4 = vld [vmem:[#allocation5 + $0x28] sm:$0xff]  ;;  %s626_s20 = scalar_lea.hbm %s1375_s7, %s842_s30  ;;  %s628_s18 = sshll.u32 %s345_s21, 4  ;;  %s629_s18 = int_to_ptr.vmem [resolvable:$true] %s628_s18 }
  0x3a   : > { %499 = vmatpush.bf16.msra.mxu1 %v860_v2  ;;  %v858_v5 = vld [vmem:[#allocation7 + $0x28] sm:$0xff]  ;;  %v849_v6 = vld [vmem:[#allocation5 + $0x20] sm:$0xff]  ;;  %v848_v8 = vld [vmem:[#allocation5 + $0x18] sm:$0xff]  ;;  %s616_s8 = scalar_lea.sflag [#allocation4], %s1303_s15  ;;  %s1095_s28 = scalar_lea.hbm %s1375_s7, 16 }
  0x3b   : > { %v857_v7 = vld [vmem:[#allocation7 + $0x20] sm:$0xff]  ;;  %v856_v9 = vld [vmem:[#allocation7 + $0x18] sm:$0xff]  ;;  %v847_v10 = vld [vmem:[#allocation5 + $0x10] sm:$0xff] }
  0x3c   : > { %v855_v11 = vld [vmem:[#allocation7 + $0x10] sm:$0xff]  ;;  %v846_v12 = vld [vmem:[#allocation5 + $0x8] sm:$0xff]  ;;  %v845_v13 = vld [vmem:[#allocation5] sm:$0xff] }
  0x3d   : > { %417 = vmatpush.bf16.msra.mxu0 %v851_v1  ;;  %v346_v14 = vld [vmem:[%s1309_s1] sm:$0xff]  ;;  %v854_v16 = vld [vmem:[#allocation7 + $0x8] sm:$0xff]  ;;  %v853_v17 = vld [vmem:[#allocation7] sm:$0xff]  ;;  %s630_s1 = sshll.u32 %s626_s20, 4  ;;  %s631_s1 = int_to_ptr.hbm [resolvable:$true] %s630_s1 }
  0x3e   : > { %500 = vmatpush.bf16.msra.mxu1 %v859_v3  ;;  %v364_v15 = vpack.c.bf16 %v346_v14, %v346_v14  ;;  %v868_v18 = vld [vmem:[#allocation8 + $0x38] sm:$0xff]  ;;  %v867_v19 = vld [vmem:[#allocation8 + $0x30] sm:$0xff]  ;;  %v866_v20 = vld [vmem:[#allocation8 + $0x28] sm:$0xff]  ;;  %s1089_s9 = sshra.s32 %s631_s1, 4  ;;  %s1090_s9 = int_to_ptr.hbm [resolvable:$true] %s1089_s9 }
  0x3f   : > { %582 = vmatpush.bf16.msra.mxu2 %v868_v18  ;;  %v865_v21 = vld [vmem:[#allocation8 + $0x20] sm:$0xff]  ;;  %v864_v22 = vld [vmem:[#allocation8 + $0x18] sm:$0xff]  ;;  %v863_v23 = vld [vmem:[#allocation8 + $0x10] sm:$0xff]  ;;  %s1091_s13 = scalar_lea.hbm %s1090_s9, 8  ;;  %p1096_p12 = scmp.lt.s32.totalorder %s1090_s9, %s1375_s7 }
  0x40   : > { %v948_v24 = vld [vmem:[%s1370_s2] ss:$0 sm:$0xff]  ;;  %v862_v30 = vld [vmem:[#allocation8 + $0x8] sm:$0xff]  ;;  %v861_v31 = vld [vmem:[#allocation8] sm:$0xff]  ;;  %p1092_p1 = scmp.ne.s32.totalorder %s1090_s9, %s1091_s13  ;;  %p1097_p8 = scmp.lt.s32.totalorder %s1095_s28, %s1091_s13 }
  0x41   : > { %418 = vmatpush.bf16.msra.mxu0 %v850_v4  ;;  %v949_v32 = vld [vmem:[%s1372_s4] ss:$0 sm:$0xff] }
  0x42   : > { %501 = vmatpush.bf16.msra.mxu1 %v858_v5  ;;  %v950_v38 = vld [vmem:[%s1374_s6] ss:$0 sm:$0xff]  ;;  %p1093_p3 = pnand %p1092_p1, %p1272_p13  ;;  %p1098_p7 = por %p1097_p8, %p1096_p12 }
  0x43   : > { %583 = vmatpush.bf16.msra.mxu2 %v867_v19 }
  0x44   : > { %p1094_p5 = pneg %p1093_p3 }
  0x45   : > { %419 = vmatpush.bf16.msra.mxu0 %v849_v6 }
  0x46   : > { %502 = vmatpush.bf16.msra.mxu1 %v857_v7  ;;  %p1099_p9 = pnand %p1098_p7, %p1094_p5 }
  0x47   : > { %584 = vmatpush.bf16.msra.mxu2 %v866_v20 }
  0x49   : > { %420 = vmatpush.bf16.msra.mxu0 %v848_v8 }
  0x4a   : > { %503 = vmatpush.bf16.msra.mxu1 %v856_v9 }
  0x4b   : > { %585 = vmatpush.bf16.msra.mxu2 %v865_v21 }
  0x4d   : > { %421 = vmatpush.bf16.msra.mxu0 %v847_v10 }
  0x4e   : > { %504 = vmatpush.bf16.msra.mxu1 %v855_v11 }
  0x4f   : > { %586 = vmatpush.bf16.msra.mxu2 %v864_v22 }
  0x51   : > { %422 = vmatpush.bf16.msra.mxu0 %v846_v12 }
  0x52   : > { %505 = vmatpush.bf16.msra.mxu1 %v854_v16 }
  0x53   : > { %587 = vmatpush.bf16.msra.mxu2 %v863_v23 }
  0x55   : > { %423 = vmatpush.bf16.msra.mxu0 %v845_v13 }
  0x56   : > { %506 = vmatpush.bf16.msra.mxu1 %v853_v17 }
  0x57   : > { %588 = vmatpush.bf16.msra.mxu2 %v862_v30 }
  0x58   : > { %424 = vmatmul.bf16.vlgmr.msra.gmra.mxu0 %v364_v15 }
  0x5b   : > { %589 = vmatpush.bf16.msra.mxu2 %v861_v31 }
  0xd5   : > { %v425_v25 = vpop.f32.mrf.mxu0 }
  0xd6   : > { %v426_v26 = vadd.f32 %v948_v24, %v425_v25 }
  0xd8   : > { %v429_v27 = vmax.f32 %v426_v26, 0.0 }
  0xda   : > { %v447_v28 = vpack.c.bf16 %v429_v27, %v429_v27 }
  0xdc   : > { %507 = vmatmul.bf16.vlgmr.msra.gmra.mxu1 %v447_v28 }
  0xdd   : > { %v427_v29 = vpop.f32.mrf.mxu0 }
 0x159   : > { %v508_v33 = vpop.f32.mrf.mxu1 }
 0x15a   : > { %v509_v34 = vadd.f32 %v949_v32, %v508_v33 }
 0x15c   : > { %v512_v35 = vmax.f32 %v509_v34, 0.0 }
 0x15e   : > { %v530_v36 = vpack.c.bf16 %v512_v35, %v512_v35 }
 0x160   : > { %590 = vmatmul.bf16.vlgmr.msra.gmra.mxu2 %v530_v36 }
 0x161   : > { %v510_v37 = vpop.f32.mrf.mxu1 }
 0x1e3   : > { %v591_v39 = vpop.f32.mrf.mxu2 }
 0x1e4   : > { %v592_v40 = vadd.f32 %v950_v38, %v591_v39 }
 0x1e6   : > { %v840_v41 = vmul.f32 -1.442695, %v592_v40 }
 0x1e8   : > { %951 = vpow2.f32 %v840_v41 }
 0x1eb   : > { %v593_v42 = vpop.f32.mrf.mxu2 }
 0x1ee   : > { %v952_v43 = vpop.eup %951 }
 0x1ef   : > { %v598_v44 = vadd.f32 1.0, %v952_v43 }
 0x1f1   : > { %953 = vrcp.f32 %v598_v44  ;;  %v610_v48 = vand.u32 2147483648, %v598_v44  ;;  %v608_v50 = vand.u32 2147483647, %v598_v44  ;;  %vm604_vm1 = vweird.f32 %v598_v44 }
 0x1f3   : > { %v611_v52 = vor.u32 1.1754944e-38, %v610_v48  ;;  %vm609_vm3 = vcmp.eq.f32.partialorder %v608_v50, 8.507059e+37 }
 0x1f7   : > { %v954_v45 = vpop.eup %953 }
 0x1f8   : > { %v600_v46 = vmul.f32 %v954_v45, %v598_v44  ;;  %vm605_vm0 = vweird.f32 %v954_v45 }
 0x1f9   : > { %vm606_vm2 = vmor %vm604_vm1, %vm605_vm0 }
 0x1fa   : > { %v601_v47 = vsub.f32 1.0, %v600_v46 }
 0x1fc   : > { %v602_v49 = vmul.f32 %v954_v45, %v601_v47 }
 0x1fe   : > { %v603_v51 = vadd.f32 %v954_v45, %v602_v49 }
 0x200   : > { %v607_v53 = vsel %vm606_vm2, %v954_v45, %v603_v51 }
 0x201   : > { %v612_v54 = vsel %vm609_vm3, %v611_v52, %v607_v53 }
 0x202   : > { %614 = vst [vmem:[%s345_s21] sm:$0xff] %v612_v54 }
 0x203   : > { %1102 = shalt.err (!%p1099_p9)
}
 0x204   : > { %883 = dma.vmem_to_hbm [thread:$0]  (%p1272_p13), %s629_s18, 128, %s631_s1, %s616_s8  }
 0x205 PF: > { %s642_s15 = sand.u32 1, %s1137_s24   ;;  %p1384_p10 = scmp.ge.s32.totalorder %s1149_s27, 2 }
 0x206   : > { %s643_s30 = scalar_lea.sflag [#allocation4], %s642_s15 }
 0x207   : > { %p900_p11 = pnand %p1384_p10, %p1277_p4 }
 0x209   : > { %p901_p0 = pneg %p900_p11 }
 0x20b   : > { %1132 = dma.done.wait (%p901_p0), %s643_s30, 128  }
 0x20c   : > { %1134 = vsyncadd (%p901_p0), %s643_s30, 4294967168  ;;  %p22_p2 = scmp.ge.s32.totalorder %s1252_s10, 4   ;;  %s1385_s24 = smov %s1141_s25 }
 0x20d   : > { %s1386_s25 = smov %s1145_s26  ;;  %s1387_s26 = smov %s1264_s11 }
 0x20e   : > { %s1388_s27 = smov %s1252_s10  ;;  %24 = sbr.rel (!%p22_p2) target bundleno = 9 (0x9), region = 105 }
 0x213   :  { %649 = vsyncpa [#allocation3], 1 }
 0x214   :  { %651 = vsyncpa [#allocation3 + $0x1], 1 }
 0x215   :  { %652 = vsyncpa [#allocation6], 1 }
 0x216   :  { %653 = vsyncpa [#allocation9], 1 }
 0x217   :  { %654 = vsyncpa [#allocation4], 1 }
 0x218   :  { %656 = vsyncpa [#allocation4 + $0x1], 1 }

</bundles_post_ra>
